<compile_context>
chip_gen: v7x
topology: tpu7x:2x2x1
jax: 0.10.0
libtpu: 0.0.40
codegen_flags: <defaults>
</compile_context>

<pallas_src>
import functools

import jax
import jax.numpy as jnp
from jax.experimental import pallas as pl
from jax.experimental.pallas import tpu as pltpu


def _round_up(n, m):
    return ((n + m - 1) // m) * m


def _pwff_kernel(eps, x_ref, w1_ref, b1_ref, w2_ref, b2_ref, g_ref, beta_ref, o_ref):
    x = x_ref[...]                                              # (Rb, D) f32

    # Linear 1 + ReLU: bf16 operands on the MXU, f32 accumulation.
    z = jnp.dot(x.astype(w1_ref.dtype), w1_ref[...],
                preferred_element_type=jnp.float32) + b1_ref[...]
    z = jnp.maximum(z, 0.0)
    # TODO(synk): nn.Dropout is identity here (inference); no in-kernel RNG dropout.

    # Linear 2 (back to d_model), f32 accumulation.
    y = jnp.dot(z.astype(w2_ref.dtype), w2_ref[...],
                preferred_element_type=jnp.float32) + b2_ref[...]

    # Residual + LayerNorm in f32.
    h = y + x
    mu = jnp.mean(h, axis=-1, keepdims=True)
    var = jnp.mean((h - mu) ** 2, axis=-1, keepdims=True)
    scale = jax.lax.rsqrt(var + eps) * g_ref[...]               # fold gamma into scale
    o_ref[...] = ((h - mu) * scale + beta_ref[...]).astype(o_ref.dtype)


def positionwise_feed_forward(x, params, *, block_rows=256, use_bf16=True,
                              eps=1e-5, interpret=False):
    """x: (..., d_model) float32.

    params: w1 (D, Dff), b1 (Dff,), w2 (Dff, D), b2 (D,), ln_g (D,), ln_b (D,).
    """
    orig_shape = x.shape
    D = orig_shape[-1]
    Dff = params['w1'].shape[1]

    # FFN is purely positionwise: flatten leading dims into rows.
    x2 = x.reshape(-1, D).astype(jnp.float32)
    n = x2.shape[0]

    br = max(8, min(block_rows, _round_up(n, 8)))   # rows per grid step (multiple of 8)
    n_pad = _round_up(n, br)
    if n_pad != n:
        x2 = jnp.pad(x2, ((0, n_pad - n), (0, 0)))

    wdt = jnp.bfloat16 if use_bf16 else jnp.float32
    w1 = params['w1'].astype(wdt)
    w2 = params['w2'].astype(wdt)
    b1 = params['b1'].reshape(1, Dff).astype(jnp.float32)
    b2 = params['b2'].reshape(1, D).astype(jnp.float32)
    g = params['ln_g'].reshape(1, D).astype(jnp.float32)
    beta = params['ln_b'].reshape(1, D).astype(jnp.float32)

    def full_spec(a):
        nd = a.ndim
        return pl.BlockSpec(a.shape, lambda i, _nd=nd: (0,) * _nd)

    # Rough VMEM footprint: resident weights/params + double-buffered x/out tiles +
    # the (br, Dff) intermediate.  Leave generous headroom, clamp to physical (v7x).
    wbytes = w1.size * w1.dtype.itemsize + w2.size * w2.dtype.itemsize
    pbytes = (b1.size + b2.size + g.size + beta.size) * 4
    tbytes = 2 * (br * D * 4) * 2 + br * Dff * 4
    vmem_limit = int(min(64 * 2**20, max(32 * 2**20, 2 * (wbytes + pbytes + tbytes))))

    out = pl.pallas_call(
        functools.partial(_pwff_kernel, eps),
        out_shape=jax.ShapeDtypeStruct((n_pad, D), x.dtype),
        grid=(n_pad // br,),
        in_specs=[pl.BlockSpec((br, D), lambda i: (i, 0)),
                  full_spec(w1), full_spec(b1),
                  full_spec(w2), full_spec(b2),
                  full_spec(g), full_spec(beta)],
        out_specs=pl.BlockSpec((br, D), lambda i: (i, 0)),
        compiler_params=pltpu.CompilerParams(
            dimension_semantics=("parallel",),      # independent row tiles
            vmem_limit_bytes=vmem_limit,
        ),
        interpret=interpret,
    )(x2, w1, b1, w2, b2, g, beta)

    return out[:n].reshape(orig_shape)


# ---------------- pure-JAX reference (f32, HIGHEST precision) ----------------
def positionwise_feed_forward_ref(x, params, eps=1e-5):
    hp = jax.lax.Precision.HIGHEST
    z = jnp.maximum(jnp.dot(x, params['w1'], precision=hp) + params['b1'], 0.0)
    y = jnp.dot(z, params['w2'], precision=hp) + params['b2']
    h = y + x
    mu = jnp.mean(h, axis=-1, keepdims=True)
    var = jnp.mean((h - mu) ** 2, axis=-1, keepdims=True)
    return (h - mu) * jax.lax.rsqrt(var + eps) * params['ln_g'] + params['ln_b']


if __name__ == "__main__":
    B, T, D, Dff = 2, 8, 32, 128          # batch, seq, d_model, d_ff

    key = jax.random.PRNGKey(0)
    kx, k1, k2, k3, k4, k5, k6 = jax.random.split(key, 7)
    s = 0.05
    x = jax.random.normal(kx, (B, T, D), jnp.float32)
    params = {
        'w1':   jax.random.normal(k1, (D, Dff), jnp.float32) * s,
        'b1':   jax.random.normal(k2, (Dff,),   jnp.float32) * s,
        'w2':   jax.random.normal(k3, (Dff, D), jnp.float32) * s,
        'b2':   jax.random.normal(k4, (D,),     jnp.float32) * s,
        'ln_g': 1.0 + jax.random.normal(k5, (D,), jnp.float32) * s,
        'ln_b': jax.random.normal(k6, (D,), jnp.float32) * s,
    }

    out = positionwise_feed_forward(x, params)
    out = jax.block_until_ready(out)
    assert out.shape == (B, T, D)

    ref = positionwise_feed_forward_ref(x, params)
    max_err = float(jnp.max(jnp.abs(out - ref)))
    # bf16 matmul operands vs. f32 HIGHEST-precision reference -> loosened tolerance.
    assert max_err < 2e-2, f"max abs err = {max_err}"
    print("KERNEL_OK")
</pallas_src>

<mosaic_0001>
module attributes {stable_mosaic.version = 11 : i64} {
  func.func @_pwff_kernel(%arg0: i32, %arg1: memref<16x32xf32, #tpu.memory_space<vmem>>, %arg2: memref<32x128xbf16, #tpu.memory_space<vmem>>, %arg3: memref<1x128xf32, #tpu.memory_space<vmem>>, %arg4: memref<128x32xbf16, #tpu.memory_space<vmem>>, %arg5: memref<1x32xf32, #tpu.memory_space<vmem>>, %arg6: memref<1x32xf32, #tpu.memory_space<vmem>>, %arg7: memref<1x32xf32, #tpu.memory_space<vmem>>, %arg8: memref<16x32xf32, #tpu.memory_space<vmem>>) attributes {dimension_semantics = [#tpu.dimension_semantics<parallel>], iteration_bounds = array<i64: 1>, scalar_prefetch = 0 : i64, scratch_operands = 0 : i64, tpu.core_type = #tpu.core_type<tc>, window_params = [{transform_indices = @transform_0, window_bounds = array<i64: 16, 32>}, {pipeline_mode = #tpu.pipeline_mode<synchronous>, transform_indices = @transform_1, window_bounds = array<i64: 32, 128>}, {pipeline_mode = #tpu.pipeline_mode<synchronous>, transform_indices = @transform_2, window_bounds = array<i64: 1, 128>}, {pipeline_mode = #tpu.pipeline_mode<synchronous>, transform_indices = @transform_3, window_bounds = array<i64: 128, 32>}, {pipeline_mode = #tpu.pipeline_mode<synchronous>, transform_indices = @transform_4, window_bounds = array<i64: 1, 32>}, {pipeline_mode = #tpu.pipeline_mode<synchronous>, transform_indices = @transform_5, window_bounds = array<i64: 1, 32>}, {pipeline_mode = #tpu.pipeline_mode<synchronous>, transform_indices = @transform_6, window_bounds = array<i64: 1, 32>}, {transform_indices = @transform_7, window_bounds = array<i64: 16, 32>}]} {
    %c0 = arith.constant 0 : index
    %c0_0 = arith.constant 0 : index
    %0 = vector.load %arg1[%c0, %c0_0] : memref<16x32xf32, #tpu.memory_space<vmem>>, vector<16x32xf32>
    %1 = arith.truncf %0 : vector<16x32xf32> to vector<16x32xbf16>
    %c0_1 = arith.constant 0 : index
    %c0_2 = arith.constant 0 : index
    %2 = vector.load %arg2[%c0_1, %c0_2] : memref<32x128xbf16, #tpu.memory_space<vmem>>, vector<32x128xbf16>
    %cst = arith.constant dense<0.000000e+00> : vector<16x128xf32>
    %3 = tpu.matmul %1, %2, %cst {dimension_numbers = #tpu.dot_dimension_numbers<[1], [0], [0], [1], [0, 0, 1, 1], [], []>} : vector<16x32xbf16>, vector<32x128xbf16>, vector<16x128xf32> -> vector<16x128xf32>
    %c0_3 = arith.constant 0 : index
    %c0_4 = arith.constant 0 : index
    %4 = vector.load %arg3[%c0_3, %c0_4] : memref<1x128xf32, #tpu.memory_space<vmem>>, vector<1x128xf32>
    %5 = vector.broadcast %4 : vector<1x128xf32> to vector<16x128xf32>
    %6 = arith.addf %3, %5 : vector<16x128xf32>
    %cst_5 = arith.constant 0.000000e+00 : f32
    %7 = vector.broadcast %cst_5 : f32 to vector<16x128xf32>
    %8 = arith.maximumf %6, %7 : vector<16x128xf32>
    %9 = arith.truncf %8 : vector<16x128xf32> to vector<16x128xbf16>
    %c0_6 = arith.constant 0 : index
    %c0_7 = arith.constant 0 : index
    %10 = vector.load %arg4[%c0_6, %c0_7] : memref<128x32xbf16, #tpu.memory_space<vmem>>, vector<128x32xbf16>
    %cst_8 = arith.constant dense<0.000000e+00> : vector<16x32xf32>
    %11 = tpu.matmul %9, %10, %cst_8 {dimension_numbers = #tpu.dot_dimension_numbers<[1], [0], [0], [1], [0, 0, 1, 1], [], []>} : vector<16x128xbf16>, vector<128x32xbf16>, vector<16x32xf32> -> vector<16x32xf32>
    %c0_9 = arith.constant 0 : index
    %c0_10 = arith.constant 0 : index
    %12 = vector.load %arg5[%c0_9, %c0_10] : memref<1x32xf32, #tpu.memory_space<vmem>>, vector<1x32xf32>
    %13 = vector.broadcast %12 : vector<1x32xf32> to vector<16x32xf32>
    %14 = arith.addf %11, %13 : vector<16x32xf32>
    %15 = arith.addf %14, %0 : vector<16x32xf32>
    %cst_11 = arith.constant dense<0.000000e+00> : vector<16xf32>
    %16 = vector.multi_reduction <add>, %15, %cst_11 [1] : vector<16x32xf32> to vector<16xf32>
    %17 = vector.shape_cast %16 : vector<16xf32> to vector<16x1xf32>
    %cst_12 = arith.constant 3.200000e+01 : f32
    %18 = vector.broadcast %cst_12 : f32 to vector<16x1xf32>
    %19 = arith.divf %17, %18 : vector<16x1xf32>
    %20 = vector.broadcast %19 : vector<16x1xf32> to vector<16x32xf32>
    %21 = arith.subf %15, %20 : vector<16x32xf32>
    %22 = arith.mulf %21, %21 : vector<16x32xf32>
    %cst_13 = arith.constant dense<0.000000e+00> : vector<16xf32>
    %23 = vector.multi_reduction <add>, %22, %cst_13 [1] : vector<16x32xf32> to vector<16xf32>
    %24 = vector.shape_cast %23 : vector<16xf32> to vector<16x1xf32>
    %cst_14 = arith.constant 3.200000e+01 : f32
    %25 = vector.broadcast %cst_14 : f32 to vector<16x1xf32>
    %26 = arith.divf %24, %25 : vector<16x1xf32>
    %cst_15 = arith.constant 9.99999974E-6 : f32
    %27 = vector.broadcast %cst_15 : f32 to vector<16x1xf32>
    %28 = arith.addf %26, %27 : vector<16x1xf32>
    %29 = math.rsqrt %28 : vector<16x1xf32>
    %c0_16 = arith.constant 0 : index
    %c0_17 = arith.constant 0 : index
    %30 = vector.load %arg6[%c0_16, %c0_17] : memref<1x32xf32, #tpu.memory_space<vmem>>, vector<1x32xf32>
    %31 = vector.broadcast %29 : vector<16x1xf32> to vector<16x32xf32>
    %32 = vector.broadcast %30 : vector<1x32xf32> to vector<16x32xf32>
    %33 = arith.mulf %31, %32 : vector<16x32xf32>
    %34 = vector.broadcast %19 : vector<16x1xf32> to vector<16x32xf32>
    %35 = arith.subf %15, %34 : vector<16x32xf32>
    %36 = arith.mulf %35, %33 : vector<16x32xf32>
    %c0_18 = arith.constant 0 : index
    %c0_19 = arith.constant 0 : index
    %37 = vector.load %arg7[%c0_18, %c0_19] : memref<1x32xf32, #tpu.memory_space<vmem>>, vector<1x32xf32>
    %38 = vector.broadcast %37 : vector<1x32xf32> to vector<16x32xf32>
    %39 = arith.addf %36, %38 : vector<16x32xf32>
    %c0_20 = arith.constant 0 : index
    %c0_21 = arith.constant 0 : index
    %40 = vector.load %arg8[%c0_20, %c0_21] : memref<16x32xf32, #tpu.memory_space<vmem>>, vector<16x32xf32>
    tpu.vector_store %arg8[%c0_20, %c0_21], %39 {strides = array<i32>} : memref<16x32xf32, #tpu.memory_space<vmem>>, vector<16x32xf32>,
    return
  }
  func.func @transform_0(%arg0: i32) -> (i32, i32) {
    %c0_i32 = arith.constant 0 : i32
    %c0_i32_0 = arith.constant 0 : i32
    return %arg0, %c0_i32 : i32, i32
  }
  func.func @transform_1(%arg0: i32) -> (i32, i32) {
    %c0_i32 = arith.constant 0 : i32
    %c0_i32_0 = arith.constant 0 : i32
    %c0_i32_1 = arith.constant 0 : i32
    return %c0_i32, %c0_i32_0 : i32, i32
  }
  func.func @transform_2(%arg0: i32) -> (i32, i32) {
    %c0_i32 = arith.constant 0 : i32
    %c0_i32_0 = arith.constant 0 : i32
    %c0_i32_1 = arith.constant 0 : i32
    return %c0_i32, %c0_i32_0 : i32, i32
  }
  func.func @transform_3(%arg0: i32) -> (i32, i32) {
    %c0_i32 = arith.constant 0 : i32
    %c0_i32_0 = arith.constant 0 : i32
    %c0_i32_1 = arith.constant 0 : i32
    return %c0_i32, %c0_i32_0 : i32, i32
  }
  func.func @transform_4(%arg0: i32) -> (i32, i32) {
    %c0_i32 = arith.constant 0 : i32
    %c0_i32_0 = arith.constant 0 : i32
    %c0_i32_1 = arith.constant 0 : i32
    return %c0_i32, %c0_i32_0 : i32, i32
  }
  func.func @transform_5(%arg0: i32) -> (i32, i32) {
    %c0_i32 = arith.constant 0 : i32
    %c0_i32_0 = arith.constant 0 : i32
    %c0_i32_1 = arith.constant 0 : i32
    return %c0_i32, %c0_i32_0 : i32, i32
  }
  func.func @transform_6(%arg0: i32) -> (i32, i32) {
    %c0_i32 = arith.constant 0 : i32
    %c0_i32_0 = arith.constant 0 : i32
    %c0_i32_1 = arith.constant 0 : i32
    return %c0_i32, %c0_i32_0 : i32, i32
  }
  func.func @transform_7(%arg0: i32) -> (i32, i32) {
    %c0_i32 = arith.constant 0 : i32
    %c0_i32_0 = arith.constant 0 : i32
    return %arg0, %c0_i32 : i32, i32
  }
}

</mosaic_0001>

<bundles_post_ra>
// kernel: tpu_custom_call.1
= control target key start
LH: loop header
LB: loop body
LE: loop exit
PB: predicated region body
PF: predicated region fallthrough
CT: control target
= control target key end

     0   :  { %v377_v1 = vmov 0.0   ;;  %vm378_vm0 = vmmov 0   ;;  %vm54_vm1 = vcmask 261120   ;;  %s489_s0 = inlined_call_operand.vmem [shape: f32[16,32], index: 0, kind: input, shape index: {}]   ;;  %s490_s1 = inlined_call_operand.vmem [shape: bf16[32,128], index: 1, kind: input, shape index: {}]   ;;  %s491_s2 = inlined_call_operand.vmem [shape: f32[1,128], index: 2, kind: input, shape index: {}]   ;;  %s492_s3 = inlined_call_operand.vmem [shape: bf16[128,32], index: 3, kind: input, shape index: {}]   ;;  %s493_s4 = inlined_call_operand.vmem [shape: f32[1,32], index: 4, kind: input, shape index: {}]   ;;  %s494_s5 = inlined_call_operand.vmem [shape: f32[1,32], index: 5, kind: input, shape index: {}]   ;;  %s495_s6 = inlined_call_operand.vmem [shape: f32[1,32], index: 6, kind: input, shape index: {}]   ;;  %s496_s7 = inlined_call_operand.hbm [shape: f32[16,32], index: 7, kind: output, shape index: {}]  }
   0x1   :  { %v339_v0 = vld [vmem:[%s490_s1] sm:$0xff]   ;;  %306 = vmatprep.subr.bf16.mxu0 %v377_v1  ;;  %v340_v2 = vld [vmem:[%s490_s1 + $0x8] sm:$0xff]   ;;  %314 = vmatprep.subr.bf16.mxu1 %v377_v1  ;;  %v343_v8 = vld [vmem:[%s492_s3 + $0x10] sm:$0xff]  }
   0x2   :  { %307 = vmatpush3.bf16.msra.mxu0 %v339_v0  ;;  %310 = vmatprep.mubr.msk.bf16.mxu0 %vm378_vm0, %v377_v1  ;;  %v28_v3 = vld [vmem:[%s489_s0] sm:$0xff]  ;;  %v29_v4 = vld [vmem:[%s489_s0 + $0x8] sm:$0xff] }
   0x3   :  { %308 = vmatprep.subr.bf16.mxu0 %v377_v1  ;;  %v341_v5 = vld [vmem:[%s492_s3] sm:$0xff]   ;;  %330 = vmatprep.mubr.msk.bf16.mxu1 %vm378_vm0, %v377_v1  ;;  %v30_v6 = vpack.c.bf16 %v29_v4, %v28_v3  ;;  %v342_v7 = vld [vmem:[%s492_s3 + $0x8] sm:$0xff]  }
   0x4   :  { %315 = vmatpush3.bf16.msra.mxu1 %v341_v5 }
   0x5   :  { %316 = vmatprep.subr.bf16.mxu1 %v377_v1 }
   0x6   :  { %309 = vmatpush3.bf16.msra.mxu0 %v340_v2 }
   0x8   :  { %317 = vmatpush3.bf16.msra.mxu1 %v342_v7 }
   0x9   :  { %311 = vmatmul.mubr.msk.bf16.vlgmr.msra.gmra.mrb[0].mxu0 %vm54_vm1, %v30_v6  ;;  %318 = vmatprep.subr.bf16.mxu1 %v377_v1 }
   0xa   :  { %12 = vsyncpa [#allocation3], 0  ;;  %v344_v9 = vld [vmem:[%s492_s3 + $0x18] sm:$0xff]   ;;  %v345_v10 = vld [vmem:[%s492_s3 + $0x20] sm:$0xff]   ;;  %s379_s28 = smov [#allocation2]  }
   0xb   :  { %v346_v11 = vld [vmem:[%s492_s3 + $0x28] sm:$0xff]   ;;  %v347_v12 = vld [vmem:[%s492_s3 + $0x30] sm:$0xff]   ;;  %v348_v13 = vld [vmem:[%s492_s3 + $0x38] sm:$0xff]   ;;  %s268_s29 = sshll.u32 %s379_s28, 4  ;;  %s269_s29 = int_to_ptr.vmem [resolvable:$true] %s268_s29 }
   0xc   :  { %319 = vmatpush3.bf16.msra.mxu1 %v343_v8  ;;  %v279_v14 = vld [vmem:[%s491_s2] ss:$0 sm:$0xff]  ;;  %p358_p1 = scmp.lt.s32.totalorder %s269_s29, %s269_s29 }
   0xd   :  { %320 = vmatprep.subr.bf16.mxu1 %v377_v1  ;;  %v283_v24 = vld [vmem:[%s493_s4] ss:$0 sm:$0xff] }
   0xe   :  { %v292_v51 = vld [vmem:[%s494_s5] ss:$0 sm:$0xff]  ;;  %s353_s5 = scalar_lea.vmem %s269_s29, 256 }
   0xf   :  { %v293_v54 = vld [vmem:[%s495_s6] ss:$0 sm:$0xff]  ;;  %p354_p0 = scmp.ne.s32.totalorder %s269_s29, %s353_s5  ;;  %p359_p2 = scmp.lt.s32.totalorder %s353_s5, %s353_s5 }
  0x10   :  { %321 = vmatpush3.bf16.msra.mxu1 %v344_v9 }
  0x11   :  { %322 = vmatprep.subr.bf16.mxu1 %v377_v1  ;;  %p360_p3 = por %p359_p2, %p358_p1 }
  0x13   :  { %p361_p4 = pnand %p360_p3, %p354_p0 }
  0x14   :  { %323 = vmatpush3.bf16.msra.mxu1 %v345_v10 }
  0x15   :  { %324 = vmatprep.subr.bf16.mxu1 %v377_v1 }
  0x18   :  { %325 = vmatpush3.bf16.msra.mxu1 %v346_v11 }
  0x19   :  { %326 = vmatprep.subr.bf16.mxu1 %v377_v1 }
  0x1c   :  { %327 = vmatpush3.bf16.msra.mxu1 %v347_v12 }
  0x1d   :  { %328 = vmatprep.subr.bf16.mxu1 %v377_v1 }
  0x20   :  { %329 = vmatpush3.bf16.msra.mxu1 %v348_v13 }
  0xdc   :  { %v92_v15 = vpop.f32.mrb[0].mxu0 }
  0xdd   :  { %v93_v16 = vadd.f32 %v279_v14, %v92_v15  ;;  %v312_v17 = vpop.f32.mrb[1].mxu0 }
  0xde   :  { %v95_v18 = vpop.f32.mrb[2].mxu0 }
  0xdf   :  { %v96_v19 = vadd.f32 %v279_v14, %v95_v18  ;;  %v313_v20 = vpop.f32.mrb[3].mxu0  ;;  %v99_v21 = vmax.f32 %v93_v16, 0.0 }
  0xe1   :  { %v100_v22 = vmax.f32 %v96_v19, 0.0 }
  0xe3   :  { %v101_v23 = vpack.c.bf16 %v100_v22, %v99_v21 }
  0xe5   :  { %331 = vmatmul.mubr.bf16.vlgmr.msra.gmra.mrb[0].mxu1 %v101_v23 }
 0x1b8   :  { %v207_v25 = vpop.f32.mrb[0].mxu1 }
 0x1b9   :  { %v208_v26 = vadd.f32 %v283_v24, %v207_v25  ;;  %v332_v27 = vpop.f32.mrb[1].mxu1 }
 0x1ba   :  { %v210_v28 = vpop.f32.mrb[2].mxu1 }
 0x1bb   :  { %v211_v29 = vadd.f32 %v283_v24, %v210_v28  ;;  %v333_v30 = vpop.f32.mrb[3].mxu1  ;;  %v214_v31 = vadd.f32 %v208_v26, %v28_v3 }
 0x1bd   :  { %v216_v32 = vsel %vm54_vm1, %v214_v31, 0.0  ;;  %v215_v33 = vadd.f32 %v211_v29, %v29_v4 }
 0x1be   :  { %217 = vadd.xlane.f32.xlu0 %v216_v32 }
 0x1bf   :  { %v219_v34 = vsel %vm54_vm1, %v215_v33, 0.0 }
 0x1c2   :  { %220 = vadd.xlane.f32.xlu0 %v219_v34 }
 0x24b   :  { %v218_v35 = vpop.xlane.xlu0 %217 }
 0x24c   :  { %v223_v36 = vmul.f32 0.03125, %v218_v35 }
 0x24e   :  { %v225_v37 = vsub.f32 %v214_v31, %v223_v36 }
 0x24f   :  { %v221_v38 = vpop.xlane.xlu0 %220 }
 0x250   :  { %v224_v39 = vmul.f32 0.03125, %v221_v38  ;;  %v227_v40 = vmul.f32 %v225_v37, %v225_v37 }
 0x252   :  { %v226_v41 = vsub.f32 %v215_v33, %v224_v39  ;;  %v229_v42 = vsel %vm54_vm1, %v227_v40, 0.0 }
 0x253   :  { %230 = vadd.xlane.f32.xlu1 %v229_v42 }
 0x254   :  { %v228_v43 = vmul.f32 %v226_v41, %v226_v41 }
 0x256   :  { %v232_v44 = vsel %vm54_vm1, %v228_v43, 0.0 }
 0x257   :  { %233 = vadd.xlane.f32.xlu1 %v232_v44 }
 0x2e0   :  { %v231_v45 = vpop.xlane.xlu1 %230 }
 0x2e1   :  { %v235_v46 = vmul.f32 0.03125, %v231_v45 }
 0x2e3   :  { %v237_v47 = vadd.f32 1e-05, %v235_v46 }
 0x2e4   :  { %v234_v48 = vpop.xlane.xlu1 %233 }
 0x2e5   :  { %349 = vrsqrt.f32 %v237_v47  ;;  %v236_v49 = vmul.f32 0.03125, %v234_v48 }
 0x2e7   :  { %v238_v50 = vadd.f32 1e-05, %v236_v49 }
 0x2e9   :  { %351 = vrsqrt.f32 %v238_v50 }
 0x2ef   :  { %v350_v52 = vpop.eup %349 }
 0x2f0   :  { %v248_v53 = vmul.f32 %v350_v52, %v292_v51 }
 0x2f2   :  { %v250_v55 = vmul.f32 %v248_v53, %v225_v37 }
 0x2f3   :  { %v352_v56 = vpop.eup %351 }
 0x2f4   :  { %v249_v57 = vmul.f32 %v352_v56, %v292_v51  ;;  %v259_v58 = vadd.f32 %v293_v54, %v250_v55 }
 0x2f6   :  { %v251_v59 = vmul.f32 %v249_v57, %v226_v41  ;;  %261 = vst.msk [vmem:[#allocation2] sm:$0xff] %vm54_vm1, %v259_v58 }
 0x2f8   :  { %v260_v60 = vadd.f32 %v293_v54, %v251_v59 }
 0x2fa   :  { %262 = vst.msk [vmem:[#allocation2 + $0x8] sm:$0xff] %vm54_vm1, %v260_v60 }
 0x2fb   :  { %364 = shalt.err (!%p361_p4)
}
 0x2fc   :  { %s365_s8 = scalar_lea.hbm %s496_s7, 256 }
 0x2fd   :  { %p366_p5 = scmp.ne.s32.totalorder %s496_s7, %s365_s8  ;;  %p369_p6 = scmp.lt.u32.totalorder %s365_s8, %s496_s7 }
 0x2ff   :  { %p371_p7 = pnand %p369_p6, %p366_p5 }
 0x301   :  { %374 = shalt.err (!%p371_p7)
}
 0x302   :  { %s380_s12 = smov 128   ;;  %s381_s13 = smov 8  }
 0x303   :  { %274 = dma.vmem_to_hbm [thread:$0]  %s269_s29, 256, %s496_s7, [#allocation3], %s380_s12, %s380_s12, %s381_s13  }
 0x304   :  { %375 = dma.done.wait [#allocation3], 256  }
 0x305   :  { %376 = vsyncadd [#allocation3], 4294967040 }
 0x306   :  { %278 = vsyncpa [#allocation3], 1 }

</bundles_post_ra>
